<compile_context>
chip_gen: v5e
topology: v5e:2x2
jax: 0.10.0
libtpu: 0.0.40
codegen_flags: <defaults>
</compile_context>

<pallas_src>
import functools

import jax
import jax.numpy as jnp
from jax.experimental import pallas as pl
from jax.experimental.pallas import tpu as pltpu


def _round_up(n: int, m: int) -> int:
    return ((n + m - 1) // m) * m


def _fused_mlp_kernel(x_ref, w_ref, b_ref, o_ref, *, num_linear: int, k_pad: int):
    """Entire MLP forward in one kernel; activations never touch HBM.

    x_ref: (Bp, Kp)      padded f32 input activations
    w_ref: (L, Kp, Np)   zero-padded stacked bf16 weights, (in, out) layout
    b_ref: (L, Np)       zero-padded stacked f32 biases
    o_ref: (Bp, Np)      padded output
    """
    act = x_ref[...].astype(jnp.float32)
    # num_linear is a small static count: unroll in Python so every matmul has
    # static shapes and the scheduler can interleave MXU / VPU work freely.
    for layer in range(num_linear):
        # Padded lanes beyond the real fan_in are exactly zero, so slicing to
        # the first k_pad lanes is lossless and keeps the MXU K dim small.
        lhs = act[:, :k_pad].astype(jnp.bfloat16)
        y = jnp.dot(lhs, w_ref[layer], preferred_element_type=jnp.float32)
        y = y + b_ref[layer][None, :]          # f32 bias broadcast over rows
        if layer < num_linear - 1:             # ReLU on all but the last layer
            y = jnp.maximum(y, 0.0)
        act = y                                # (Bp, Np), stays in vregs/VMEM
    o_ref[...] = act.astype(o_ref.dtype)


def pack_mlp_params(params):
    """Zero-pad and stack per-layer (W, b) into lane-dense fused buffers.

    params: list of (W, b) with W of shape (fan_in, fan_out), any float dtype.
    Returns (w_stack[bf16], b_stack[f32], dim_in, dim_out, Kp, Np, layer_dims).
    """
    L = len(params)
    dim_in = params[0][0].shape[0]
    dim_out = params[-1][0].shape[1]
    fan_ins = [w.shape[0] for w, _ in params]
    fan_outs = [w.shape[1] for w, _ in params]

    kp = _round_up(max(fan_ins), 16)                 # bf16 sublane tile
    np_ = _round_up(max(fan_outs), 128)              # lane-dense outputs
    np_ = max(np_, _round_up(kp, 128))               # activations must cover Kp

    w_stack = jnp.zeros((L, kp, np_), jnp.bfloat16)
    b_stack = jnp.zeros((L, np_), jnp.float32)
    for l, (w, b) in enumerate(params):
        fi, fo = w.shape
        w_stack = w_stack.at[l, :fi, :fo].set(w.astype(jnp.bfloat16))
        b_stack = b_stack.at[l, :fo].set(b.astype(jnp.float32))

    layer_dims = tuple((int(w.shape[0]), int(w.shape[1])) for w, _ in params)
    return w_stack, b_stack, dim_in, dim_out, kp, np_, layer_dims


@functools.partial(
    jax.jit, static_argnames=("dim_in", "dim_out", "kp", "np_", "layer_dims"))
def _mlp_forward(w_stack, b_stack, x, *, dim_in, dim_out, kp, np_, layer_dims):
    B = x.shape[0]
    L = w_stack.shape[0]
    Bp = _round_up(B, 8)                             # f32 sublane-aligned batch

    x_pad = (jnp.zeros((Bp, kp), jnp.float32)
             .at[:B, :dim_in].set(x.astype(jnp.float32)))

    # Cost estimate from REAL (unpadded) dims.
    flops = 2 * B * sum(fi * fo for fi, fo in layer_dims)
    bytes_accessed = (4 * B * dim_in + 4 * B * dim_out
                      + sum(2 * fi * fo + 4 * fo for fi, fo in layer_dims))

    # Whole problem is VMEM-resident (no grid -> no double-buffering); budget
    # it explicitly with headroom instead of relying on the default scoped
    # limit (16 MiB on v5e, 32 MiB on v6e/v7x).
    resident = (x_pad.size * 4 + Bp * np_ * 4        # in + out, f32
                + w_stack.size * 2 + b_stack.size * 4)
    vmem_limit = int(min(max(2 * resident + (4 << 20), 32 << 20), 100 << 20))

    kernel = functools.partial(_fused_mlp_kernel, num_linear=L, k_pad=kp)
    out_pad = pl.pallas_call(
        kernel,
        out_shape=jax.ShapeDtypeStruct((Bp, np_), x.dtype),
        # Single grid point: the whole (padded) problem fits VMEM comfortably.
        in_specs=[
            pl.BlockSpec((Bp, kp), lambda: (0, 0)),
            pl.BlockSpec((L, kp, np_), lambda: (0, 0, 0)),
            pl.BlockSpec((L, np_), lambda: (0, 0)),
        ],
        out_specs=pl.BlockSpec((Bp, np_), lambda: (0, 0)),
        cost_estimate=pl.CostEstimate(
            flops=flops, transcendentals=0, bytes_accessed=bytes_accessed),
        compiler_params=pltpu.CompilerParams(
            dimension_semantics=(), vmem_limit_bytes=vmem_limit),
    )(x_pad, w_stack, b_stack)

    return out_pad[:B, :dim_out]


def mlp_forward_fused(packed, x):
    """Matches MLP.forward: ReLU after every layer except the last."""
    w_stack, b_stack, dim_in, dim_out, kp, np_, layer_dims = packed
    assert x.shape[1] == dim_in, (x.shape, dim_in)
    return _mlp_forward(w_stack, b_stack, x, dim_in=dim_in, dim_out=dim_out,
                        kp=kp, np_=np_, layer_dims=layer_dims)


def init_mlp_params(key, dim, hidden_dim, num_layers, dtype=jnp.float32):
    """Deterministic init mirroring nn.Linear's default (uniform +-1/sqrt(fan_in)).

    Returns list of (W, b) with W of shape (in_features, out_features).
    """
    sizes = ([(dim, hidden_dim)]
             + [(hidden_dim, hidden_dim)] * (num_layers - 1)
             + [(hidden_dim, dim)])
    params = []
    for fan_in, fan_out in sizes:
        key, kw, kb = jax.random.split(key, 3)
        bound = 1.0 / (fan_in ** 0.5)
        w = jax.random.uniform(kw, (fan_in, fan_out), dtype, -bound, bound)
        b = jax.random.uniform(kb, (fan_out,), dtype, -bound, bound)
        params.append((w, b))
    return params


def mlp_reference(params, x):
    """Pure-JAX f32 reference for correctness checking."""
    xt = x
    for w, b in params[:-1]:
        xt = jnp.maximum(xt @ w + b, 0.0)
    w, b = params[-1]
    return xt @ w + b


if __name__ == "__main__":
    dim = 16
    hidden_dim = 32
    num_layers = 3
    batch = 8

    key = jax.random.PRNGKey(0)
    key, kx = jax.random.split(key)
    x = jax.random.normal(kx, (batch, dim), jnp.float32)

    params = init_mlp_params(key, dim, hidden_dim, num_layers)
    packed = pack_mlp_params(params)

    out = mlp_forward_fused(packed, x)
    out = jax.block_until_ready(out)

    ref = mlp_reference(params, x)
    assert out.shape == (batch, dim), out.shape
    # bf16 weights / bf16 matmul operands -> ~1e-2-level agreement vs f32 ref.
    assert jnp.allclose(out, ref, atol=2e-2, rtol=2e-2), "mismatch vs reference"

    print("KERNEL_OK")
</pallas_src>

<mosaic_0001>
module attributes {stable_mosaic.version = 11 : i64} {
  func.func @_fused_mlp_kernel(%arg0: memref<8x32xf32, #tpu.memory_space<vmem>>, %arg1: memref<4x32x128xbf16, #tpu.memory_space<vmem>>, %arg2: memref<4x128xf32, #tpu.memory_space<vmem>>, %arg3: memref<8x128xf32, #tpu.memory_space<vmem>>) attributes {dimension_semantics = [], scalar_prefetch = 0 : i64, scratch_operands = 0 : i64, tpu.core_type = #tpu.core_type<tc>} {
    %c0 = arith.constant 0 : index
    %c0_0 = arith.constant 0 : index
    %0 = vector.load %arg0[%c0, %c0_0] : memref<8x32xf32, #tpu.memory_space<vmem>>, vector<8x32xf32>
    %1 = arith.truncf %0 : vector<8x32xf32> to vector<8x32xbf16>
    %c0_1 = arith.constant 0 : index
    %c0_2 = arith.constant 0 : index
    %c0_3 = arith.constant 0 : index
    %2 = vector.load %arg1[%c0_1, %c0_2, %c0_3] : memref<4x32x128xbf16, #tpu.memory_space<vmem>>, vector<1x32x128xbf16>
    %3 = vector.shape_cast %2 : vector<1x32x128xbf16> to vector<32x128xbf16>
    %cst = arith.constant dense<0.000000e+00> : vector<8x128xf32>
    %4 = tpu.matmul %1, %3, %cst {dimension_numbers = #tpu.dot_dimension_numbers<[1], [0], [0], [1], [0, 0, 1, 1], [], []>} : vector<8x32xbf16>, vector<32x128xbf16>, vector<8x128xf32> -> vector<8x128xf32>
    %c0_4 = arith.constant 0 : index
    %c0_5 = arith.constant 0 : index
    %5 = vector.load %arg2[%c0_4, %c0_5] : memref<4x128xf32, #tpu.memory_space<vmem>>, vector<1x128xf32>
    %6 = vector.shape_cast %5 : vector<1x128xf32> to vector<128xf32>
    %7 = vector.shape_cast %6 : vector<128xf32> to vector<1x128xf32>
    %8 = vector.broadcast %7 : vector<1x128xf32> to vector<8x128xf32>
    %9 = arith.addf %4, %8 : vector<8x128xf32>
    %cst_6 = arith.constant 0.000000e+00 : f32
    %10 = vector.broadcast %cst_6 : f32 to vector<8x128xf32>
    %11 = arith.maximumf %9, %10 : vector<8x128xf32>
    %12 = vector.extract_strided_slice %11 {offsets = [0, 0], sizes = [8, 32], strides = [1, 1]} : vector<8x128xf32> to vector<8x32xf32>
    %13 = arith.truncf %12 : vector<8x32xf32> to vector<8x32xbf16>
    %c1 = arith.constant 1 : index
    %c0_7 = arith.constant 0 : index
    %c0_8 = arith.constant 0 : index
    %14 = vector.load %arg1[%c1, %c0_7, %c0_8] : memref<4x32x128xbf16, #tpu.memory_space<vmem>>, vector<1x32x128xbf16>
    %15 = vector.shape_cast %14 : vector<1x32x128xbf16> to vector<32x128xbf16>
    %cst_9 = arith.constant dense<0.000000e+00> : vector<8x128xf32>
    %16 = tpu.matmul %13, %15, %cst_9 {dimension_numbers = #tpu.dot_dimension_numbers<[1], [0], [0], [1], [0, 0, 1, 1], [], []>} : vector<8x32xbf16>, vector<32x128xbf16>, vector<8x128xf32> -> vector<8x128xf32>
    %c1_10 = arith.constant 1 : index
    %c0_11 = arith.constant 0 : index
    %17 = vector.load %arg2[%c1_10, %c0_11] : memref<4x128xf32, #tpu.memory_space<vmem>>, vector<1x128xf32>
    %18 = vector.shape_cast %17 : vector<1x128xf32> to vector<128xf32>
    %19 = vector.shape_cast %18 : vector<128xf32> to vector<1x128xf32>
    %20 = vector.broadcast %19 : vector<1x128xf32> to vector<8x128xf32>
    %21 = arith.addf %16, %20 : vector<8x128xf32>
    %cst_12 = arith.constant 0.000000e+00 : f32
    %22 = vector.broadcast %cst_12 : f32 to vector<8x128xf32>
    %23 = arith.maximumf %21, %22 : vector<8x128xf32>
    %24 = vector.extract_strided_slice %23 {offsets = [0, 0], sizes = [8, 32], strides = [1, 1]} : vector<8x128xf32> to vector<8x32xf32>
    %25 = arith.truncf %24 : vector<8x32xf32> to vector<8x32xbf16>
    %c2 = arith.constant 2 : index
    %c0_13 = arith.constant 0 : index
    %c0_14 = arith.constant 0 : index
    %26 = vector.load %arg1[%c2, %c0_13, %c0_14] : memref<4x32x128xbf16, #tpu.memory_space<vmem>>, vector<1x32x128xbf16>
    %27 = vector.shape_cast %26 : vector<1x32x128xbf16> to vector<32x128xbf16>
    %cst_15 = arith.constant dense<0.000000e+00> : vector<8x128xf32>
    %28 = tpu.matmul %25, %27, %cst_15 {dimension_numbers = #tpu.dot_dimension_numbers<[1], [0], [0], [1], [0, 0, 1, 1], [], []>} : vector<8x32xbf16>, vector<32x128xbf16>, vector<8x128xf32> -> vector<8x128xf32>
    %c2_16 = arith.constant 2 : index
    %c0_17 = arith.constant 0 : index
    %29 = vector.load %arg2[%c2_16, %c0_17] : memref<4x128xf32, #tpu.memory_space<vmem>>, vector<1x128xf32>
    %30 = vector.shape_cast %29 : vector<1x128xf32> to vector<128xf32>
    %31 = vector.shape_cast %30 : vector<128xf32> to vector<1x128xf32>
    %32 = vector.broadcast %31 : vector<1x128xf32> to vector<8x128xf32>
    %33 = arith.addf %28, %32 : vector<8x128xf32>
    %cst_18 = arith.constant 0.000000e+00 : f32
    %34 = vector.broadcast %cst_18 : f32 to vector<8x128xf32>
    %35 = arith.maximumf %33, %34 : vector<8x128xf32>
    %36 = vector.extract_strided_slice %35 {offsets = [0, 0], sizes = [8, 32], strides = [1, 1]} : vector<8x128xf32> to vector<8x32xf32>
    %37 = arith.truncf %36 : vector<8x32xf32> to vector<8x32xbf16>
    %c3 = arith.constant 3 : index
    %c0_19 = arith.constant 0 : index
    %c0_20 = arith.constant 0 : index
    %38 = vector.load %arg1[%c3, %c0_19, %c0_20] : memref<4x32x128xbf16, #tpu.memory_space<vmem>>, vector<1x32x128xbf16>
    %39 = vector.shape_cast %38 : vector<1x32x128xbf16> to vector<32x128xbf16>
    %cst_21 = arith.constant dense<0.000000e+00> : vector<8x128xf32>
    %40 = tpu.matmul %37, %39, %cst_21 {dimension_numbers = #tpu.dot_dimension_numbers<[1], [0], [0], [1], [0, 0, 1, 1], [], []>} : vector<8x32xbf16>, vector<32x128xbf16>, vector<8x128xf32> -> vector<8x128xf32>
    %c3_22 = arith.constant 3 : index
    %c0_23 = arith.constant 0 : index
    %41 = vector.load %arg2[%c3_22, %c0_23] : memref<4x128xf32, #tpu.memory_space<vmem>>, vector<1x128xf32>
    %42 = vector.shape_cast %41 : vector<1x128xf32> to vector<128xf32>
    %43 = vector.shape_cast %42 : vector<128xf32> to vector<1x128xf32>
    %44 = vector.broadcast %43 : vector<1x128xf32> to vector<8x128xf32>
    %45 = arith.addf %40, %44 : vector<8x128xf32>
    %c0_24 = arith.constant 0 : index
    %c0_25 = arith.constant 0 : index
    %46 = vector.load %arg3[%c0_24, %c0_25] : memref<8x128xf32, #tpu.memory_space<vmem>>, vector<8x128xf32>
    tpu.vector_store %arg3[%c0_24, %c0_25], %45 {strides = array<i32>} : memref<8x128xf32, #tpu.memory_space<vmem>>, vector<8x128xf32>,
    return
  }
}

</mosaic_0001>

<bundles_post_ra>
// kernel: _mlp_forward.1
= control target key start
LH: loop header
LB: loop body
LE: loop exit
PB: predicated region body
PF: predicated region fallthrough
CT: control target
= control target key end

     0   :  { %8 = vsyncpa [#allocation3], 0  ;;  %s351_s0 = inlined_call_operand.vmem [shape: f32[8,32], index: 0, kind: input, shape index: {}]   ;;  %s352_s1 = inlined_call_operand.hbm [shape: bf16[4,32,128], index: 1, kind: input, shape index: {}]   ;;  %s353_s2 = inlined_call_operand.vmem [shape: f32[4,128], index: 2, kind: input, shape index: {}]   ;;  %s354_s3 = inlined_call_operand.hbm [shape: f32[8,128], index: 3, kind: output, shape index: {}]  }
   0x1   :  { %9 = vsyncpa [#allocation4], 0  ;;  %s16_s14 = sshll.u32 %s352_s1, 4  ;;  %s302_s15 = smov [#allocation2]   ;;  %s17_s14 = int_to_ptr.hbm [resolvable:$true] %s16_s14 }
   0x2   :  { %s18_s16 = sshll.u32 %s302_s15, 4  ;;  %s303_s17 = smov 64   ;;  %s19_s16 = int_to_ptr.vmem [resolvable:$true] %s18_s16 }
   0x3   :  { %s304_s18 = smov 4  }
   0x4   :  { %24 = dma.hbm_to_vmem [thread:$0]  %s17_s14, 1024, %s19_s16, [#allocation3], %s303_s17, %s303_s17, %s304_s18  }
   0x5   :  { %298 = dma.done.wait [#allocation3], 1024  }
   0x6   :  { %299 = vsyncadd [#allocation3], 4294966272  ;;  %v235_v0 = vld [vmem:[#allocation2 + $0x8] sm:$0xff]  ;;  %v234_v1 = vld [vmem:[#allocation2] sm:$0xff]  ;;  %vm52_vm0 = vcmask 261120   ;;  %s305_s27 = smov [#allocation5]  }
   0x7   :  { %62 = vmatpush.bf16.msra.mxu0 %v235_v0  ;;  %v32_v2 = vld [vmem:[%s351_s0] sm:$0xff]  ;;  %v237_v4 = vld [vmem:[#allocation2 + $0x18] sm:$0xff]  ;;  %v236_v5 = vld [vmem:[#allocation2 + $0x10] sm:$0xff]  ;;  %s186_s28 = sshll.u32 %s305_s27, 4  ;;  %s188_s4 = sshll.u32 %s354_s3, 4  ;;  %s187_s28 = int_to_ptr.vmem [resolvable:$true] %s186_s28  ;;  %s189_s4 = int_to_ptr.hbm [resolvable:$true] %s188_s4 }
   0x8   :  { %v33_v3 = vpack.c.bf16 %v32_v2, %v32_v2  ;;  %99 = vmatpush.bf16.msra.mxu1 %v237_v4  ;;  %v246_v6 = vld [vmem:[%s353_s2] ss:$0 sm:$0xff]  ;;  %v239_v12 = vld [vmem:[#allocation2 + $0x28] sm:$0xff]  ;;  %v247_v14 = vld [vmem:[%s353_s2 + $0x1] ss:$0 sm:$0xff] }
   0x9   :  { %136 = vmatpush.bf16.msra.mxu2 %v239_v12  ;;  %v238_v13 = vld [vmem:[#allocation2 + $0x20] sm:$0xff]  ;;  %v241_v20 = vld [vmem:[#allocation2 + $0x38] sm:$0xff]  ;;  %v240_v21 = vld [vmem:[#allocation2 + $0x30] sm:$0xff] }
   0xa   :  { %173 = vmatpush.bf16.msra.mxu3 %v241_v20  ;;  %v248_v22 = vld [vmem:[%s353_s2 + $0x2] ss:$0 sm:$0xff]  ;;  %v249_v28 = vld [vmem:[%s353_s2 + $0x3] ss:$0 sm:$0xff] }
   0xb   :  { %63 = vmatpush.bf16.msra.mxu0 %v234_v1 }
   0xc   :  { %100 = vmatpush.bf16.msra.mxu1 %v236_v5 }
   0xd   :  { %137 = vmatpush.bf16.msra.mxu2 %v238_v13 }
   0xe   :  { %206 = vmatmul.msk.bf16.vlgmr.msra.gmra.mxu0 %vm52_vm0, %v33_v3  ;;  %174 = vmatpush.bf16.msra.mxu3 %v240_v21 }
  0x8b   :  { %v65_v7 = vpop.f32.mrf.mxu0 }
  0x8c   :  { %v66_v8 = vadd.f32 %v246_v6, %v65_v7 }
  0x8e   :  { %v69_v9 = vmax.f32 %v66_v8, 0.0 }
  0x90   :  { %v70_v10 = vpack.c.bf16 %v69_v9, %v69_v9 }
  0x92   :  { %215 = vmatmul.msk.bf16.vlgmr.msra.gmra.mxu1 %vm52_vm0, %v70_v10 }
  0x93   :  { %v67_v11 = vpop.f32.mrf.mxu0 }
 0x10f   :  { %v102_v15 = vpop.f32.mrf.mxu1 }
 0x110   :  { %v103_v16 = vadd.f32 %v247_v14, %v102_v15 }
 0x112   :  { %v106_v17 = vmax.f32 %v103_v16, 0.0 }
 0x114   :  { %v107_v18 = vpack.c.bf16 %v106_v17, %v106_v17 }
 0x116   :  { %224 = vmatmul.msk.bf16.vlgmr.msra.gmra.mxu2 %vm52_vm0, %v107_v18 }
 0x117   :  { %v104_v19 = vpop.f32.mrf.mxu1 }
 0x199   :  { %v139_v23 = vpop.f32.mrf.mxu2 }
 0x19a   :  { %v140_v24 = vadd.f32 %v248_v22, %v139_v23 }
 0x19c   :  { %v143_v25 = vmax.f32 %v140_v24, 0.0 }
 0x19e   :  { %v144_v26 = vpack.c.bf16 %v143_v25, %v143_v25 }
 0x1a0   :  { %233 = vmatmul.msk.bf16.vlgmr.msra.gmra.mxu3 %vm52_vm0, %v144_v26 }
 0x1a1   :  { %v141_v27 = vpop.f32.mrf.mxu2 }
 0x223   :  { %v176_v29 = vpop.f32.mrf.mxu3 }
 0x224   :  { %v177_v30 = vadd.f32 %v249_v28, %v176_v29 }
 0x226   :  { %180 = vst [vmem:[#allocation5] sm:$0xff] %v177_v30 }
 0x227   :  { %191 = dma.vmem_to_hbm [thread:$0]  %s187_s28, 128, %s189_s4, [#allocation4]  }
 0x22b   :  { %v178_v31 = vpop.f32.mrf.mxu3 }
 0x22c   :  { %300 = dma.done.wait [#allocation4], 128  }
 0x22d   :  { %301 = vsyncadd [#allocation4], 4294967168 }
 0x22e   :  { %196 = vsyncpa [#allocation3], 1 }
 0x22f   :  { %197 = vsyncpa [#allocation4], 1 }

</bundles_post_ra>
